<compile_context>
chip_gen: v7x
topology: tpu7x:2x2x1
jax: 0.10.0
libtpu: 0.0.40
codegen_flags: <defaults>
</compile_context>

<pallas_src>
import functools

import jax
import jax.numpy as jnp
from jax import lax
from jax.experimental import pallas as pl
from jax.experimental.pallas import tpu as pltpu


def _round_up(n, m):
    return (n + m - 1) // m * m


def _pad2d(a, rows, cols):
    r, c = a.shape
    if r == rows and c == cols:
        return a
    return jnp.pad(a, ((0, rows - r), (0, cols - c)))


def _softplus(h):
    # One exp + one log1p on the EUP; matches torch.nn.Softplus(beta=1,
    # threshold=20) to < 1 ulp in f32.
    return jnp.maximum(h, 0.0) + jnp.log1p(jnp.exp(-jnp.abs(h)))


def _vmem_cap_bytes():
    # Physical VMEM per TensorCore; conservative v7x fallback if query fails.
    try:
        return int(pltpu.get_tpu_info().vmem_capacity_bytes)
    except Exception:
        return 64 << 20


def _vmem_limit(footprint, cap):
    # 1.5x headroom for compiler temporaries, 32 MiB floor, ceiling just below
    # physical VMEM so the request is always satisfiable on this generation.
    lim = int(1.5 * footprint) + (8 << 20)
    lim = max(lim, min(32 << 20, cap - (4 << 20)))
    return min(lim, cap - (2 << 20))


# --------------------------------------------------------------------------
# Small-batch path: whole (padded) batch in one VMEM tile, fully fused.
# --------------------------------------------------------------------------
def _fused_kernel(x_ref, w1_ref, b1_ref, w2_ref, b2_ref, o_ref,
                  *, b_total, approx_recip):
    x = x_ref[...]                                     # already in MXU dtype
    h = jnp.dot(x, w1_ref[...], preferred_element_type=jnp.float32) + b1_ref[...]
    h = _softplus(h)
    logits = (jnp.dot(h.astype(w2_ref.dtype), w2_ref[...],
                      preferred_element_type=jnp.float32) + b2_ref[...])
    if logits.shape[0] > b_total:                      # mask zero-padded rows
        row = lax.broadcasted_iota(jnp.int32, logits.shape, 0)
        logits = jnp.where(row < b_total, logits, -jnp.inf)
    # softmax over dim=0 (batch axis), per class column
    m = jnp.max(logits, axis=0, keepdims=True)
    e = jnp.exp(logits - m)
    denom = jnp.sum(e, axis=0, keepdims=True)
    o_ref[...] = e * pl.reciprocal(denom, approx=approx_recip)


# --------------------------------------------------------------------------
# Large-batch pass 1: per batch tile (fully parallel over tiles) compute
# e = exp(logits - m_tile) plus per-tile softmax partials (m_tile, l_tile).
# --------------------------------------------------------------------------
def _tile_partials_kernel(x_ref, w1_ref, b1_ref, w2_ref, b2_ref,
                          e_ref, m_ref, l_ref, *, b_total, block_b, has_pad):
    i = pl.program_id(0)
    h = (jnp.dot(x_ref[...], w1_ref[...],
                 preferred_element_type=jnp.float32) + b1_ref[...])
    h = _softplus(h)
    logits = (jnp.dot(h.astype(w2_ref.dtype), w2_ref[...],
                      preferred_element_type=jnp.float32) + b2_ref[...])
    m = jnp.max(logits, axis=0, keepdims=True)         # (1, C_p), finite
    e = jnp.exp(logits - m)                            # <= 1, no overflow
    if has_pad:                                        # drop pad-row contributions
        row = lax.broadcasted_iota(jnp.int32, e.shape, 0) + i * block_b
        e = jnp.where(row < b_total, e, 0.0)
    e_out = e.astype(e_ref.dtype)                      # bf16 in bf16 mode
    e_ref[...] = e_out
    m_ref[...] = m.reshape(1, 1, -1)
    # l from the stored (possibly quantized) numerators -> columns sum to 1.
    l_ref[...] = jnp.sum(e_out.astype(jnp.float32), axis=0,
                         keepdims=True).reshape(1, 1, -1)


# --------------------------------------------------------------------------
# Large-batch pass 2: pure lane-dense multiply by the per-tile scale
# exp(m_tile - m_final) / l_final.  No exp over the big tile.
# --------------------------------------------------------------------------
def _rescale_kernel(e_ref, scale_ref, o_ref):
    o_ref[...] = (e_ref[...].astype(jnp.float32) * scale_ref[0]).astype(o_ref.dtype)


def simple_classifier_forward(x, w1, b1, w2, b2, *, block_b=None, precision="fp32"):
    """softmax(dim=0)( softplus(x @ w1 + b1) @ w2 + b2 )

    x : [B, input_dim] f32       w1: [input_dim, enc_dim]  b1: [1, enc_dim]
    w2: [enc_dim, nb_classes]    b2: [1, nb_classes]       -> [B, nb_classes] f32
    precision: "fp32" (exact PyTorch semantics) or "bf16" (bf16 MXU operands +
    bf16 x / intermediate streams; f32 elementwise & accumulation).  "bf16" is
    recommended on v5e for MXU throughput.
    """
    B, Din = x.shape
    E = w1.shape[1]
    C = w2.shape[1]
    mm_dtype = jnp.bfloat16 if precision == "bf16" else jnp.float32
    approx_recip = precision == "bf16"
    nbytes = jnp.dtype(mm_dtype).itemsize              # x / weights / intermediate

    # Lane-dense padding of all feature axes (multiples of 128) -> unmasked vst.
    Din_p = _round_up(Din, 128)
    E_p = _round_up(E, 128)
    C_p = _round_up(C, 128)
    w1p = _pad2d(w1, Din_p, E_p).astype(mm_dtype)
    b1p = _pad2d(b1, 1, E_p).astype(jnp.float32)
    w2p = _pad2d(w2, E_p, C_p).astype(mm_dtype)
    b2p = _pad2d(b2, 1, C_p).astype(jnp.float32)

    cap = _vmem_cap_bytes()
    budget = max(cap - (24 << 20), 16 << 20)           # leave pipeline headroom

    def p1_footprint(bb):
        return (2 * bb * Din_p * nbytes                      # x tile (dbl-buffered)
                + (Din_p * E_p + E_p * C_p) * nbytes         # weights (single-buf)
                + (E_p + C_p) * 4                            # biases
                + 2 * bb * C_p * nbytes                      # e out (dbl-buffered)
                + 4 * 2 * C_p * 4                            # m, l partial outputs
                + bb * E_p * 4 + 2 * bb * C_p * 4)           # live h/logits values

    if block_b is None:
        block_b = 512                                  # v6e sweet spot; shrink to fit
        while block_b > 64 and p1_footprint(block_b) > budget:
            block_b //= 2
    else:
        block_b = max(_round_up(int(block_b), 8), 8)

    B_p8 = _round_up(B, 8)
    if B_p8 <= block_b:
        # ---------------- fused single-tile path ----------------
        xp = _pad2d(x, B_p8, Din_p).astype(mm_dtype)
        foot = (B_p8 * Din_p * nbytes
                + (Din_p * E_p + E_p * C_p) * nbytes + (E_p + C_p) * 4
                + B_p8 * C_p * 4 + B_p8 * E_p * 4 + B_p8 * C_p * 4)
        cost = pl.CostEstimate(
            flops=2 * B * (Din * E + E * C),
            transcendentals=2 * B * E + B * C,
            bytes_accessed=int(xp.size * nbytes + w1p.size * nbytes
                               + w2p.size * nbytes + (E_p + C_p) * 4
                               + B_p8 * C_p * 4))
        vmem = pl.BlockSpec(memory_space=pltpu.MemorySpace.VMEM)
        out = pl.pallas_call(
            functools.partial(_fused_kernel, b_total=B, approx_recip=approx_recip),
            out_shape=jax.ShapeDtypeStruct((B_p8, C_p), jnp.float32),
            in_specs=[vmem, vmem, vmem, vmem, vmem],
            out_specs=vmem,
            compiler_params=pltpu.CompilerParams(
                vmem_limit_bytes=_vmem_limit(foot, cap)),
            cost_estimate=cost,
        )(xp, w1p, b1p, w2p, b2p)
        return out[:B, :C]

    # ---------------- batch-tiled two-pass path ----------------
    B_p = _round_up(B, block_b)
    nB = B_p // block_b
    has_pad = B_p > B
    xp = _pad2d(x, B_p, Din_p).astype(mm_dtype)        # cast at the HBM boundary

    cost1 = pl.CostEstimate(
        flops=2 * B_p * (Din_p * E_p + E_p * C_p),
        transcendentals=2 * B_p * E_p + B_p * C_p,
        bytes_accessed=int(B_p * Din_p * nbytes
                           + (Din_p * E_p + E_p * C_p) * nbytes + (E_p + C_p) * 4
                           + B_p * C_p * nbytes + 2 * nB * C_p * 4))
    vlim1 = _vmem_limit(p1_footprint(block_b), cap)

    def run_pass1(single_buffer):
        inv = {"pipeline_mode": pl.Buffered(1)} if single_buffer else {}
        return pl.pallas_call(
            functools.partial(_tile_partials_kernel, b_total=B,
                              block_b=block_b, has_pad=has_pad),
            grid=(nB,),
            out_shape=(jax.ShapeDtypeStruct((B_p, C_p), mm_dtype),   # e (bf16 in bf16 mode)
                       jax.ShapeDtypeStruct((nB, 1, C_p), jnp.float32),
                       jax.ShapeDtypeStruct((nB, 1, C_p), jnp.float32)),
            in_specs=[
                pl.BlockSpec((block_b, Din_p), lambda i: (i, 0)),            # x tiles
                pl.BlockSpec((Din_p, E_p), lambda i: (0, 0), **inv),         # w1 resident
                pl.BlockSpec((1, E_p), lambda i: (0, 0), **inv),             # b1 resident
                pl.BlockSpec((E_p, C_p), lambda i: (0, 0), **inv),           # w2 resident
                pl.BlockSpec((1, C_p), lambda i: (0, 0), **inv),             # b2 resident
            ],
            out_specs=(
                pl.BlockSpec((block_b, C_p), lambda i: (i, 0)),              # e
                pl.BlockSpec((1, 1, C_p), lambda i: (i, 0, 0)),              # m partials
                pl.BlockSpec((1, 1, C_p), lambda i: (i, 0, 0)),              # l partials
            ),
            compiler_params=pltpu.CompilerParams(
                dimension_semantics=("parallel",), vmem_limit_bytes=vlim1),
            cost_estimate=cost1,
        )(xp, w1p, b1p, w2p, b2p)

    try:
        e, m_parts, l_parts = run_pass1(True)
    except Exception:
        # Older jax without BlockSpec(pipeline_mode=...): identical kernel with
        # default (double-buffered) pipelining of the invariant operands.
        e, m_parts, l_parts = run_pass1(False)

    # Tiny (nB, C_p) partial-softmax combine: per-tile scale = exp(m_i - m*)/l*.
    m2 = m_parts[:, 0, :]
    l2 = l_parts[:, 0, :]
    m_max = jnp.max(m2, axis=0, keepdims=True)
    l_tot = jnp.sum(l2 * jnp.exp(m2 - m_max), axis=0, keepdims=True)
    scale = (jnp.exp(m2 - m_max) / l_tot)[:, None, :].astype(jnp.float32)

    foot2 = (2 * block_b * C_p * nbytes + 2 * block_b * C_p * 4
             + 2 * C_p * 4 + block_b * C_p * 4)
    cost2 = pl.CostEstimate(
        flops=B_p * C_p, transcendentals=0,
        bytes_accessed=int(B_p * C_p * (nbytes + 4) + nB * C_p * 4))
    out = pl.pallas_call(
        _rescale_kernel,
        grid=(nB,),
        out_shape=jax.ShapeDtypeStruct((B_p, C_p), jnp.float32),
        in_specs=[
            pl.BlockSpec((block_b, C_p), lambda i: (i, 0)),
            pl.BlockSpec((1, 1, C_p), lambda i: (i, 0, 0)),
        ],
        out_specs=pl.BlockSpec((block_b, C_p), lambda i: (i, 0)),
        compiler_params=pltpu.CompilerParams(
            dimension_semantics=("parallel",),
            vmem_limit_bytes=_vmem_limit(foot2, cap)),
        cost_estimate=cost2,
    )(e, scale)
    return out[:B, :C]


def _ref_forward(x, w1, b1, w2, b2):
    # Pure-JAX reference with exact PyTorch Softplus(beta=1, threshold=20).
    h = x @ w1 + b1
    h = jnp.where(h > 20.0, h, jnp.log1p(jnp.exp(jnp.minimum(h, 20.0))))
    logits = h @ w2 + b2
    return jax.nn.softmax(logits, axis=0)


if __name__ == "__main__":
    # Small shapes consistent with the module's forward.
    B, input_dim, enc_dim, nb_classes = 8, 32, 64, 16

    key = jax.random.PRNGKey(0)
    kx, kw1, kb1, kw2, kb2 = jax.random.split(key, 5)
    x = jax.random.normal(kx, (B, input_dim), dtype=jnp.float32)

    # PyTorch-Linear-style uniform init, stored pre-transposed as [in, out].
    bound1 = 1.0 / (input_dim ** 0.5)
    w1 = jax.random.uniform(kw1, (input_dim, enc_dim), jnp.float32, -bound1, bound1)
    b1 = jax.random.uniform(kb1, (1, enc_dim), jnp.float32, -bound1, bound1)
    bound2 = 1.0 / (enc_dim ** 0.5)
    w2 = jax.random.uniform(kw2, (enc_dim, nb_classes), jnp.float32, -bound2, bound2)
    b2 = jax.random.uniform(kb2, (1, nb_classes), jnp.float32, -bound2, bound2)

    ref = _ref_forward(x, w1, b1, w2, b2)

    # 1) small batch -> fused single-tile path, exact f32 semantics
    out = jax.block_until_ready(simple_classifier_forward(x, w1, b1, w2, b2))
    assert out.shape == (B, nb_classes)
    assert jnp.allclose(out, ref, atol=1e-5, rtol=1e-5)
    assert jnp.allclose(jnp.sum(out, axis=0), jnp.ones((nb_classes,)), atol=1e-5)

    # 2) bf16 MXU-operand mode (v5e/v6e throughput); elementwise stays f32
    out_bf16 = jax.block_until_ready(
        simple_classifier_forward(x, w1, b1, w2, b2, precision="bf16"))
    assert jnp.allclose(out_bf16, ref, atol=2e-2, rtol=2e-2)

    # 3) batch-tiled two-pass path (non-divisible B -> exercises masking)
    B2 = 322
    x2 = jax.random.normal(jax.random.PRNGKey(1), (B2, input_dim), jnp.float32)
    ref2 = _ref_forward(x2, w1, b1, w2, b2)
    out2 = jax.block_until_ready(
        simple_classifier_forward(x2, w1, b1, w2, b2, block_b=128))
    assert out2.shape == (B2, nb_classes)
    assert jnp.allclose(out2, ref2, atol=1e-4, rtol=1e-4)
    assert jnp.allclose(jnp.sum(out2, axis=0), jnp.ones((nb_classes,)), atol=1e-4)

    # 4) batch-tiled path with bf16 streams / intermediate
    out2_bf16 = jax.block_until_ready(
        simple_classifier_forward(x2, w1, b1, w2, b2, block_b=128, precision="bf16"))
    assert jnp.allclose(out2_bf16, ref2, atol=2e-2, rtol=2e-2)
    assert jnp.allclose(jnp.sum(out2_bf16, axis=0), jnp.ones((nb_classes,)), atol=2e-2)

    print("KERNEL_OK")
</pallas_src>

<mosaic_0001>
module attributes {stable_mosaic.version = 11 : i64} {
  func.func @_fused_kernel(%arg0: memref<8x128xf32, #tpu.memory_space<vmem>>, %arg1: memref<128x128xf32, #tpu.memory_space<vmem>>, %arg2: memref<1x128xf32, #tpu.memory_space<vmem>>, %arg3: memref<128x128xf32, #tpu.memory_space<vmem>>, %arg4: memref<1x128xf32, #tpu.memory_space<vmem>>, %arg5: memref<8x128xf32, #tpu.memory_space<vmem>>) attributes {dimension_semantics = [], scalar_prefetch = 0 : i64, scratch_operands = 0 : i64, tpu.core_type = #tpu.core_type<tc>} {
    %c0 = arith.constant 0 : index
    %c0_0 = arith.constant 0 : index
    %0 = vector.load %arg0[%c0, %c0_0] : memref<8x128xf32, #tpu.memory_space<vmem>>, vector<8x128xf32>
    %c0_1 = arith.constant 0 : index
    %c0_2 = arith.constant 0 : index
    %1 = vector.load %arg1[%c0_1, %c0_2] : memref<128x128xf32, #tpu.memory_space<vmem>>, vector<128x128xf32>
    %cst = arith.constant dense<0.000000e+00> : vector<8x128xf32>
    %2 = tpu.matmul %0, %1, %cst {dimension_numbers = #tpu.dot_dimension_numbers<[1], [0], [0], [1], [0, 0, 1, 1], [], []>} : vector<8x128xf32>, vector<128x128xf32>, vector<8x128xf32> -> vector<8x128xf32>
    %c0_3 = arith.constant 0 : index
    %c0_4 = arith.constant 0 : index
    %3 = vector.load %arg2[%c0_3, %c0_4] : memref<1x128xf32, #tpu.memory_space<vmem>>, vector<1x128xf32>
    %4 = vector.broadcast %3 : vector<1x128xf32> to vector<8x128xf32>
    %5 = arith.addf %2, %4 : vector<8x128xf32>
    %cst_5 = arith.constant 0.000000e+00 : f32
    %6 = vector.broadcast %cst_5 : f32 to vector<8x128xf32>
    %7 = arith.maximumf %5, %6 : vector<8x128xf32>
    %8 = math.absf %5 : vector<8x128xf32>
    %cst_6 = arith.constant 0.000000e+00 : f32
    %9 = vector.broadcast %cst_6 : f32 to vector<8x128xf32>
    %10 = arith.subf %9, %8 : vector<8x128xf32>
    %11 = math.exp %10 : vector<8x128xf32>
    %12 = math.log1p %11 : vector<8x128xf32>
    %13 = arith.addf %7, %12 : vector<8x128xf32>
    %c0_7 = arith.constant 0 : index
    %c0_8 = arith.constant 0 : index
    %14 = vector.load %arg3[%c0_7, %c0_8] : memref<128x128xf32, #tpu.memory_space<vmem>>, vector<128x128xf32>
    %cst_9 = arith.constant dense<0.000000e+00> : vector<8x128xf32>
    %15 = tpu.matmul %13, %14, %cst_9 {dimension_numbers = #tpu.dot_dimension_numbers<[1], [0], [0], [1], [0, 0, 1, 1], [], []>} : vector<8x128xf32>, vector<128x128xf32>, vector<8x128xf32> -> vector<8x128xf32>
    %c0_10 = arith.constant 0 : index
    %c0_11 = arith.constant 0 : index
    %16 = vector.load %arg4[%c0_10, %c0_11] : memref<1x128xf32, #tpu.memory_space<vmem>>, vector<1x128xf32>
    %17 = vector.broadcast %16 : vector<1x128xf32> to vector<8x128xf32>
    %18 = arith.addf %15, %17 : vector<8x128xf32>
    %cst_12 = arith.constant dense<0xFF800000> : vector<128xf32>
    %19 = vector.multi_reduction <maximumf>, %18, %cst_12 [0] : vector<8x128xf32> to vector<128xf32>
    %20 = vector.shape_cast %19 : vector<128xf32> to vector<1x128xf32>
    %21 = vector.broadcast %20 : vector<1x128xf32> to vector<8x128xf32>
    %22 = arith.subf %18, %21 : vector<8x128xf32>
    %23 = math.exp %22 : vector<8x128xf32>
    %cst_13 = arith.constant dense<0.000000e+00> : vector<128xf32>
    %24 = vector.multi_reduction <add>, %23, %cst_13 [0] : vector<8x128xf32> to vector<128xf32>
    %25 = vector.shape_cast %24 : vector<128xf32> to vector<1x128xf32>
    %26 = tpu.reciprocal %25 : vector<1x128xf32> -> vector<1x128xf32>
    %27 = vector.broadcast %26 : vector<1x128xf32> to vector<8x128xf32>
    %28 = arith.mulf %23, %27 : vector<8x128xf32>
    %c0_14 = arith.constant 0 : index
    %c0_15 = arith.constant 0 : index
    %29 = vector.load %arg5[%c0_14, %c0_15] : memref<8x128xf32, #tpu.memory_space<vmem>>, vector<8x128xf32>
    tpu.vector_store %arg5[%c0_14, %c0_15], %28 {strides = array<i32>} : memref<8x128xf32, #tpu.memory_space<vmem>>, vector<8x128xf32>,
    return
  }
}

</mosaic_0001>

<bundles_post_ra>
// kernel: tpu_custom_call.1
= control target key start
LH: loop header
LB: loop body
LE: loop exit
PB: predicated region body
PF: predicated region fallthrough
CT: control target
= control target key end

     0   :  { %10 = vsyncpa [#allocation3], 0  ;;  %s676_s0 = inlined_call_operand.hbm [shape: f32[8,128], index: 0, kind: input, shape index: {}]   ;;  %s677_s1 = inlined_call_operand.hbm [shape: f32[128,128], index: 1, kind: input, shape index: {}]   ;;  %s678_s2 = inlined_call_operand.vmem [shape: f32[1,128], index: 2, kind: input, shape index: {}]   ;;  %s679_s3 = inlined_call_operand.hbm [shape: f32[128,128], index: 3, kind: input, shape index: {}]   ;;  %s680_s4 = inlined_call_operand.vmem [shape: f32[1,128], index: 4, kind: input, shape index: {}]   ;;  %s681_s5 = inlined_call_operand.hbm [shape: f32[8,128], index: 5, kind: output, shape index: {}]  }
   0x1   :  { %11 = vsyncpa [#allocation6], 0 }
   0x2   :  { %12 = vsyncpa [#allocation4], 0  ;;  %s561_s18 = smov [#allocation5]   ;;  %s467_s22 = scalar_lea.hbm %s677_s1, 2048 }
   0x3   :  { %s28_s19 = sshll.u32 %s561_s18, 4  ;;  %p468_p0 = scmp.ne.s32.totalorder %s677_s1, %s467_s22  ;;  %s29_s19 = int_to_ptr.vmem [resolvable:$true] %s28_s19 }
   0x4   :  { %p471_p1 = scmp.lt.u32.totalorder %s467_s22, %s677_s1 }
   0x6   :  { %p473_p2 = pnand %p471_p1, %p468_p0 }
   0x8   :  { %476 = shalt.err (!%p473_p2)
}
   0x9   :  { %s477_s27 = scalar_lea.vmem %s29_s19, 2048  ;;  %p482_p4 = scmp.lt.s32.totalorder %s29_s19, %s29_s19 }
   0xa   :  { %p478_p3 = scmp.ne.s32.totalorder %s29_s19, %s477_s27  ;;  %p483_p5 = scmp.lt.s32.totalorder %s477_s27, %s477_s27 }
   0xc   :  { %p484_p6 = por %p483_p5, %p482_p4 }
   0xe   :  { %p485_p7 = pnand %p484_p6, %p478_p3 }
  0x10   :  { %488 = shalt.err (!%p485_p7)
}
  0x11   :  { %s562_s28 = smov 128   ;;  %s563_s29 = smov 8  }
  0x12   :  { %34 = dma.hbm_to_vmem [thread:$0]  %s677_s1, 2048, %s29_s19, [#allocation6], %s562_s28, %s562_s28, %s563_s29  }
  0x13   :  { %s564_s7 = smov [#allocation2]   ;;  %s565_s9 = smov [#allocation7]  }
  0x14   :  { %s19_s8 = sshll.u32 %s564_s7, 4  ;;  %s42_s10 = sshll.u32 %s565_s9, 4  ;;  %s20_s8 = int_to_ptr.vmem [resolvable:$true] %s19_s8  ;;  %s43_s10 = int_to_ptr.vmem [resolvable:$true] %s42_s10 }
  0x15   :  { %s489_s13 = scalar_lea.hbm %s676_s0, 128 }
  0x16   :  { %p490_p8 = scmp.ne.s32.totalorder %s676_s0, %s489_s13  ;;  %p493_p9 = scmp.lt.u32.totalorder %s489_s13, %s676_s0 }
  0x18   :  { %p495_p10 = pnand %p493_p9, %p490_p8 }
  0x1a   :  { %498 = shalt.err (!%p495_p10)
}
  0x1b   :  { %s499_s1 = scalar_lea.vmem %s20_s8, 128  ;;  %p504_p12 = scmp.lt.s32.totalorder %s20_s8, %s20_s8 }
  0x1c   :  { %p500_p11 = scmp.ne.s32.totalorder %s20_s8, %s499_s1  ;;  %p505_p13 = scmp.lt.s32.totalorder %s499_s1, %s499_s1 }
  0x1e   :  { %p506_p0 = por %p505_p13, %p504_p12 }
  0x20   :  { %p507_p1 = pnand %p506_p0, %p500_p11 }
  0x22   :  { %510 = shalt.err (!%p507_p1)
}
  0x23   :  { %22 = dma.hbm_to_vmem [thread:$0]  %s676_s0, 128, %s20_s8, [#allocation3]  }
  0x24   :  { %s511_s22 = scalar_lea.hbm %s679_s3, 2048 }
  0x25   :  { %p512_p2 = scmp.ne.s32.totalorder %s679_s3, %s511_s22  ;;  %p515_p3 = scmp.lt.u32.totalorder %s511_s22, %s679_s3 }
  0x27   :  { %p517_p4 = pnand %p515_p3, %p512_p2 }
  0x29   :  { %520 = shalt.err (!%p517_p4)
}
  0x2a   :  { %s521_s27 = scalar_lea.vmem %s43_s10, 2048  ;;  %p526_p6 = scmp.lt.s32.totalorder %s43_s10, %s43_s10 }
  0x2b   :  { %p522_p5 = scmp.ne.s32.totalorder %s43_s10, %s521_s27  ;;  %p527_p7 = scmp.lt.s32.totalorder %s521_s27, %s521_s27 }
  0x2d   :  { %p528_p8 = por %p527_p7, %p526_p6 }
  0x2f   :  { %p529_p9 = pnand %p528_p8, %p522_p5 }
  0x31   :  { %532 = shalt.err (!%p529_p9)
}
  0x32   :  { %48 = dma.hbm_to_vmem [thread:$0]  %s679_s3, 2048, %s43_s10, [#allocation6], %s562_s28, %s562_s28, %s563_s29  }
  0x33   :  { %555 = dma.done.wait [#allocation3], 128  }
  0x34   :  { %556 = vsyncadd [#allocation3], 4294967168 }
  0x35   :  { %557 = dma.done.wait [#allocation6], 4096  }
  0x36   :  { %558 = vsyncadd [#allocation6], 4294963200  ;;  %v566_v0 = vmov 0.0|0.0   ;;  %vm567_vm0 = vmmov 0   ;;  %v568_v1 = vmov 0.0   ;;  %v61_v2 = vld [vmem:[#allocation5] sm:$0xff] }
  0x37   :  { %402 = vmatprep.subr.bf16.mxu0 %v566_v0  ;;  %364 = vmatprep.mubr.msk.f32.mxu0 %vm567_vm0, %v568_v1  ;;  %v62_v3 = vld [vmem:[#allocation5 + $0x8] sm:$0xff]  ;;  %v63_v4 = vld [vmem:[#allocation5 + $0x10] sm:$0xff]  ;;  %v64_v6 = vld [vmem:[#allocation5 + $0x18] sm:$0xff] }
  0x38   :  { %426 = vmatprep.subr.bf16.mxu1 %v566_v0  ;;  %399 = vmatprep.mubr.msk.f32.mxu1 %vm567_vm0, %v568_v1  ;;  %v403_v5 = vpack.c.bf16 %v62_v3, %v61_v2  ;;  %v406_v7 = vpack.c.bf16 %v64_v6, %v63_v4  ;;  %v65_v8 = vld [vmem:[#allocation5 + $0x20] sm:$0xff]  ;;  %v66_v9 = vld [vmem:[#allocation5 + $0x28] sm:$0xff]  ;;  %v67_v11 = vld [vmem:[#allocation5 + $0x30] sm:$0xff] }
  0x39   :  { %v409_v10 = vpack.c.bf16 %v66_v9, %v65_v8  ;;  %v68_v12 = vld [vmem:[#allocation5 + $0x38] sm:$0xff]  ;;  %v69_v14 = vld [vmem:[#allocation5 + $0x40] sm:$0xff]  ;;  %v70_v15 = vld [vmem:[#allocation5 + $0x48] sm:$0xff] }
  0x3a   :  { %404 = vmatpush3.bf16.msra.mxu0 %v403_v5  ;;  %v412_v13 = vpack.c.bf16 %v68_v12, %v67_v11  ;;  %v415_v16 = vpack.c.bf16 %v70_v15, %v69_v14  ;;  %v71_v17 = vld [vmem:[#allocation5 + $0x50] sm:$0xff]  ;;  %v72_v18 = vld [vmem:[#allocation5 + $0x58] sm:$0xff]  ;;  %v73_v20 = vld [vmem:[#allocation5 + $0x60] sm:$0xff] }
  0x3b   :  { %405 = vmatprep.subr.bf16.mxu0 %v566_v0  ;;  %v418_v19 = vpack.c.bf16 %v72_v18, %v71_v17  ;;  %v74_v21 = vld [vmem:[#allocation5 + $0x68] sm:$0xff]  ;;  %v75_v23 = vld [vmem:[#allocation5 + $0x70] sm:$0xff]  ;;  %v76_v24 = vld [vmem:[#allocation5 + $0x78] sm:$0xff] }
  0x3c   :  { %v421_v22 = vpack.c.bf16 %v74_v21, %v73_v20  ;;  %v424_v25 = vpack.c.bf16 %v76_v24, %v75_v23  ;;  %v60_v26 = vld [vmem:[#allocation2] sm:$0xff]  ;;  %v169_v27 = vld [vmem:[#allocation7] sm:$0xff]  ;;  %v170_v28 = vld [vmem:[#allocation7 + $0x8] sm:$0xff] }
  0x3d   :  { %v427_v29 = vpack.c.bf16 %v170_v28, %v169_v27  ;;  %v171_v30 = vld [vmem:[#allocation7 + $0x10] sm:$0xff]  ;;  %v172_v31 = vld [vmem:[#allocation7 + $0x18] sm:$0xff]  ;;  %v173_v33 = vld [vmem:[#allocation7 + $0x20] sm:$0xff] }
  0x3e   :  { %407 = vmatpush3.bf16.msra.mxu0 %v406_v7  ;;  %v430_v32 = vpack.c.bf16 %v172_v31, %v171_v30  ;;  %v174_v34 = vld [vmem:[#allocation7 + $0x28] sm:$0xff]  ;;  %v175_v36 = vld [vmem:[#allocation7 + $0x30] sm:$0xff]  ;;  %v176_v37 = vld [vmem:[#allocation7 + $0x38] sm:$0xff] }
  0x3f   :  { %408 = vmatprep.subr.bf16.mxu0 %v566_v0  ;;  %428 = vmatpush3.bf16.msra.mxu1 %v427_v29  ;;  %v433_v35 = vpack.c.bf16 %v174_v34, %v173_v33  ;;  %v436_v38 = vpack.c.bf16 %v176_v37, %v175_v36  ;;  %v177_v39 = vld [vmem:[#allocation7 + $0x40] sm:$0xff]  ;;  %v178_v40 = vld [vmem:[#allocation7 + $0x48] sm:$0xff]  ;;  %v179_v42 = vld [vmem:[#allocation7 + $0x50] sm:$0xff] }
  0x40   :  { %429 = vmatprep.subr.bf16.mxu1 %v566_v0  ;;  %v439_v41 = vpack.c.bf16 %v178_v40, %v177_v39  ;;  %v180_v43 = vld [vmem:[#allocation7 + $0x58] sm:$0xff]  ;;  %v181_v45 = vld [vmem:[#allocation7 + $0x60] sm:$0xff]  ;;  %v182_v46 = vld [vmem:[#allocation7 + $0x68] sm:$0xff] }
  0x41   :  { %v442_v44 = vpack.c.bf16 %v180_v43, %v179_v42  ;;  %v445_v47 = vpack.c.bf16 %v182_v46, %v181_v45  ;;  %v183_v48 = vld [vmem:[#allocation7 + $0x70] sm:$0xff]  ;;  %v184_v49 = vld [vmem:[#allocation7 + $0x78] sm:$0xff] }
  0x42   :  { %410 = vmatpush3.bf16.msra.mxu0 %v409_v10  ;;  %v448_v50 = vpack.c.bf16 %v184_v49, %v183_v48  ;;  %v296_v51 = vld [vmem:[%s678_s2] ss:$0 sm:$0xff] }
  0x43   :  { %411 = vmatprep.subr.bf16.mxu0 %v566_v0  ;;  %431 = vmatpush3.bf16.msra.mxu1 %v430_v32  ;;  %v297_v5 = vld [vmem:[%s680_s4] ss:$0 sm:$0xff]  ;;  %s569_s4 = smov [#allocation8]  }
  0x44   :  { %432 = vmatprep.subr.bf16.mxu1 %v566_v0  ;;  %s286_s6 = sshll.u32 %s569_s4, 4  ;;  %s287_s6 = int_to_ptr.vmem [resolvable:$true] %s286_s6 }
  0x45   :  { %s533_s7 = scalar_lea.vmem %s287_s6, 128  ;;  %p538_p11 = scmp.lt.s32.totalorder %s287_s6, %s287_s6 }
  0x46   :  { %413 = vmatpush3.bf16.msra.mxu0 %v412_v13  ;;  %p534_p10 = scmp.ne.s32.totalorder %s287_s6, %s533_s7  ;;  %p539_p12 = scmp.lt.s32.totalorder %s533_s7, %s533_s7 }
  0x47   :  { %414 = vmatprep.subr.bf16.mxu0 %v566_v0  ;;  %434 = vmatpush3.bf16.msra.mxu1 %v433_v35 }
  0x48   :  { %435 = vmatprep.subr.bf16.mxu1 %v566_v0  ;;  %p540_p13 = por %p539_p12, %p538_p11 }
  0x4a   :  { %416 = vmatpush3.bf16.msra.mxu0 %v415_v16  ;;  %p541_p0 = pnand %p540_p13, %p534_p10 }
  0x4b   :  { %417 = vmatprep.subr.bf16.mxu0 %v566_v0  ;;  %437 = vmatpush3.bf16.msra.mxu1 %v436_v38 }
  0x4c   :  { %438 = vmatprep.subr.bf16.mxu1 %v566_v0 }
  0x4e   :  { %419 = vmatpush3.bf16.msra.mxu0 %v418_v19 }
  0x4f   :  { %420 = vmatprep.subr.bf16.mxu0 %v566_v0  ;;  %440 = vmatpush3.bf16.msra.mxu1 %v439_v41 }
  0x50   :  { %441 = vmatprep.subr.bf16.mxu1 %v566_v0 }
  0x52   :  { %422 = vmatpush3.bf16.msra.mxu0 %v421_v22 }
  0x53   :  { %423 = vmatprep.subr.bf16.mxu0 %v566_v0  ;;  %443 = vmatpush3.bf16.msra.mxu1 %v442_v44 }
  0x54   :  { %444 = vmatprep.subr.bf16.mxu1 %v566_v0 }
  0x56   :  { %425 = vmatpush3.bf16.msra.mxu0 %v424_v25 }
  0x57   :  { %446 = vmatpush3.bf16.msra.mxu1 %v445_v47 }
  0x58   :  { %447 = vmatprep.subr.bf16.mxu1 %v566_v0 }
  0x59   :  { %365 = vmatmul.mubr.f32.vlgmr.msra.gmra.mrb[0].mxu0 %v60_v26 }
  0x5b   :  { %449 = vmatpush3.bf16.msra.mxu1 %v448_v50 }
 0x12c   :  { %v150_v52 = vpop.f32.mrb[0].mxu0 }
 0x12d   :  { %v151_v53 = vadd.f32 %v296_v51, %v150_v52  ;;  %v366_v54 = vpop.f32.mrb[1].mxu0 }
 0x12f   :  { %v155_v55 = vand.u32 2147483647, %v151_v53  ;;  %v154_v2 = vmax.f32 %v151_v53, 0.0 }
 0x131   :  { %v156_v56 = vsub.f32 0.0, %v155_v55 }
 0x133   :  { %v157_v57 = vmul.f32 1.442695, %v156_v56 }
 0x135   :  { %459 = vpow2.f32 %v157_v57 }
 0x13f   :  { %v460_v58 = vpop.eup %459 }
 0x140   :  { %v159_v59 = vadd.f32 1.0, %v460_v58  ;;  %v162_v60 = vmul.f32 -0.5, %v460_v58  ;;  %v165_v62 = vand.u32 2147483647, %v460_v58 }
 0x142   :  { %461 = vlog2.f32 %v159_v59  ;;  %v163_v61 = vadd.f32 1.0, %v162_v60  ;;  %vm166_vm1 = vcmp.lt.f32.partialorder %v165_v62, 0.0004427343 }
 0x144   :  { %v164_v1 = vmul.f32 %v460_v58, %v163_v61 }
 0x14c   :  { %v462_v63 = vpop.eup %461 }
 0x14d   :  { %v161_v0 = vmul.f32 0.6931472, %v462_v63 }
 0x14f   :  { %v167_v3 = vsel %vm166_vm1, %v164_v1, %v161_v0 }
 0x150   :  { %v168_v4 = vadd.f32 %v167_v3, %v154_v2 }
 0x152   :  { %400 = vmatmul.mubr.f32.vlgmr.msra.gmra.mrb[0].mxu1 %v168_v4 }
 0x225   :  { %v258_v6 = vpop.f32.mrb[0].mxu1 }
 0x226   :  { %v259_v7 = vadd.f32 %v297_v5, %v258_v6  ;;  %v401_v8 = vpop.f32.mrb[1].mxu1 }
 0x228   :  { %v262_v9 = vrot.slane %v259_v7, 4 }
 0x22a   :  { %v263_v10 = vmax.f32 %v259_v7, %v262_v9 }
 0x22c   :  { %v264_v11 = vrot.slane %v263_v10, 2 }
 0x22e   :  { %v265_v12 = vmax.f32 %v263_v10, %v264_v11 }
 0x230   :  { %v266_v13 = vrot.slane %v265_v12, 1 }
 0x232   :  { %v267_v14 = vmax.f32 %v265_v12, %v266_v13 }
 0x234   :  { %v268_v15 = vsub.f32 %v259_v7, %v267_v14 }
 0x236   :  { %v269_v16 = vmul.f32 1.442695, %v268_v15 }
 0x238   :  { %463 = vpow2.f32 %v269_v16 }
 0x242   :  { %v464_v17 = vpop.eup %463 }
 0x243   :  { %v271_v18 = vrot.slane %v464_v17, 4 }
 0x245   :  { %v272_v19 = vadd.f32 %v464_v17, %v271_v18 }
 0x247   :  { %v273_v20 = vrot.slane %v272_v19, 2 }
 0x249   :  { %v274_v21 = vadd.f32 %v273_v20, %v272_v19 }
 0x24b   :  { %v275_v22 = vrot.slane %v274_v21, 1 }
 0x24d   :  { %v276_v23 = vadd.f32 %v275_v22, %v274_v21 }
 0x24f   :  { %465 = vrcp.f32 %v276_v23 }
 0x259   :  { %v466_v24 = vpop.eup %465 }
 0x25a   :  { %v278_v25 = vmul.f32 %v466_v24, %v464_v17 }
 0x25c   :  { %279 = vst [vmem:[#allocation8] sm:$0xff] %v278_v25 }
 0x25d   :  { %544 = shalt.err (!%p541_p0)
}
 0x25e   :  { %s545_s10 = scalar_lea.hbm %s681_s5, 128 }
 0x25f   :  { %p546_p1 = scmp.ne.s32.totalorder %s681_s5, %s545_s10  ;;  %p549_p2 = scmp.lt.u32.totalorder %s545_s10, %s681_s5 }
 0x261   :  { %p551_p3 = pnand %p549_p2, %p546_p1 }
 0x263   :  { %554 = shalt.err (!%p551_p3)
}
 0x264   :  { %289 = dma.vmem_to_hbm [thread:$0]  %s287_s6, 128, %s681_s5, [#allocation4]  }
 0x265   :  { %559 = dma.done.wait [#allocation4], 128  }
 0x266   :  { %560 = vsyncadd [#allocation4], 4294967168 }
 0x267   :  { %293 = vsyncpa [#allocation3], 1 }
 0x268   :  { %294 = vsyncpa [#allocation6], 1 }
 0x269   :  { %295 = vsyncpa [#allocation4], 1 }

</bundles_post_ra>
